<compile_context>
chip_gen: v7x
topology: tpu7x:2x2x1
jax: 0.10.0
libtpu: 0.0.40
codegen_flags: <defaults>
</compile_context>

<pallas_src>
import functools

import jax
import jax.numpy as jnp
from jax import lax
from jax.experimental import pallas as pl
from jax.experimental.pallas import tpu as pltpu


def _round_up(x, m):
    return ((x + m - 1) // m) * m


def gnnstack_mlp_kernel(xp_ref, xr_ref, xd_ref,
                        w1a_ref, w1b_ref, w1c_ref, b1_ref,
                        w2_ref, b2_ref, w3_ref, b3_ref,
                        o_ref, *, sub_rows):
    """Fused 3-layer MLP on one row-tile, processed in `sub_rows` chunks.

    h1 = relu(x_pdt@W1a + x_ref@W1b + x_def@W1c + b1)   (f32 acc, f32 relu)
    h2 = relu(h1@W2 + b2)
    out = h2@W3 + b3                                    (W3/b3 lane-padded)
    """
    tm = o_ref.shape[0]
    n_sub = tm // sub_rows  # static

    # Weights / biases are tiny; load once per tile and reuse across sub-blocks.
    w1a = w1a_ref[...]
    w1b = w1b_ref[...]
    w1c = w1c_ref[...]
    w2 = w2_ref[...]
    w3 = w3_ref[...]
    b1 = b1_ref[...]
    b2 = b2_ref[...]
    b3 = b3_ref[...]

    def body(s, carry):
        r = pl.multiple_of(s * sub_rows, 8)
        rows = pl.ds(r, sub_rows)
        # fc1 as three partial matmuls over the split weight (no concat needed).
        h1 = jnp.dot(xp_ref[rows, :], w1a, preferred_element_type=jnp.float32)
        h1 += jnp.dot(xr_ref[rows, :], w1b, preferred_element_type=jnp.float32)
        h1 += jnp.dot(xd_ref[rows, :], w1c, preferred_element_type=jnp.float32)
        h1 = jnp.maximum(h1 + b1, 0.0)                       # f32 bias + relu
        h2 = jnp.dot(h1.astype(w2.dtype), w2,
                     preferred_element_type=jnp.float32)
        h2 = jnp.maximum(h2 + b2, 0.0)
        h3 = jnp.dot(h2.astype(w3.dtype), w3,
                     preferred_element_type=jnp.float32)
        o_ref[rows, :] = (h3 + b3).astype(o_ref.dtype)
        return carry

    lax.fori_loop(0, n_sub, body, 0, unroll=True)


def gnnstack_forward(x_pdt, x_def, x_ref, params, *, tm=512):
    """Pure-JAX glue + fused Pallas hot path.

    x_pdt/x_def/x_ref: [..., input_dim] float32 (flattened to [N, input_dim])
    params: dict with w1,b1,w2,b2,w3,b3 (weights [in, out], biases [1, out])
    """
    w1, b1 = params["w1"], params["b1"]
    w2, b2 = params["w2"], params["b2"]
    w3, b3 = params["w3"], params["b3"]
    input_dim = w1.shape[0] // 3
    out_dim = w3.shape[-1]

    # Matches PyTorch: view(-1, input_dim); concat order is [x_pdt, x_ref, x_def].
    x_pdt = x_pdt.reshape(-1, input_dim)
    x_def = x_def.reshape(-1, input_dim)
    x_ref = x_ref.reshape(-1, input_dim)
    N = x_pdt.shape[0]

    # ---- row tiling: pad N to the tile instead of asserting divisibility ----
    tm_eff = min(tm, _round_up(N, 8))
    tm_eff = _round_up(tm_eff, 8)
    n_pad = _round_up(N, tm_eff)
    pad_rows = n_pad - N
    sub_rows = 256 if (tm_eff % 256 == 0) else tm_eff
    grid = (n_pad // tm_eff,)

    def prep_x(x):
        x = x.astype(jnp.bfloat16)                 # MXU-native operand dtype
        if pad_rows:
            x = jnp.pad(x, ((0, pad_rows), (0, 0)))
        return x

    xp = prep_x(x_pdt)
    xr = prep_x(x_ref)
    xd = prep_x(x_def)

    # Split W1 by the concat layout: rows [0:d]->x_pdt, [d:2d]->x_ref, [2d:3d]->x_def.
    w1_b = w1.astype(jnp.bfloat16)
    w1a = w1_b[:input_dim]
    w1b = w1_b[input_dim:2 * input_dim]
    w1c = w1_b[2 * input_dim:]
    w2_b = w2.astype(jnp.bfloat16)

    # Lane-dense output: zero-pad fc3 columns to a multiple of 128.
    out_pad = _round_up(out_dim, 128)
    w3_p = jnp.pad(w3, ((0, 0), (0, out_pad - out_dim))).astype(jnp.bfloat16)
    b3_p = jnp.pad(b3, ((0, 0), (0, out_pad - out_dim)))   # stays f32

    b1 = b1.astype(jnp.float32)
    b2 = b2.astype(jnp.float32)

    kernel = functools.partial(gnnstack_mlp_kernel, sub_rows=sub_rows)

    row_spec = lambda shape: pl.BlockSpec(shape, lambda i: (i, 0))
    full_spec = lambda arr: pl.BlockSpec(arr.shape, lambda i: (0, 0))

    out = pl.pallas_call(
        kernel,
        out_shape=jax.ShapeDtypeStruct((n_pad, out_pad), jnp.float32),
        grid_spec=pl.GridSpec(
            grid=grid,
            in_specs=[
                row_spec((tm_eff, input_dim)),   # x_pdt tile
                row_spec((tm_eff, input_dim)),   # x_ref tile
                row_spec((tm_eff, input_dim)),   # x_def tile
                full_spec(w1a), full_spec(w1b), full_spec(w1c), full_spec(b1),
                full_spec(w2_b), full_spec(b2),
                full_spec(w3_p), full_spec(b3_p),
            ],
            out_specs=pl.BlockSpec((tm_eff, out_pad), lambda i: (i, 0)),
        ),
        compiler_params=pltpu.CompilerParams(
            dimension_semantics=("parallel",)),
    )(xp, xr, xd, w1a, w1b, w1c, b1, w2_b, b2, w3_p, b3_p)

    return out[:N, :out_dim]


def init_params(key, input_dim, hidden_dim, output_dim):
    """Deterministic PyTorch-Linear-style init (uniform +-1/sqrt(fan_in))."""
    dims = [
        (input_dim * 3, input_dim * 2),   # fc1
        (input_dim * 2, hidden_dim),      # fc2
        (hidden_dim, output_dim),         # fc3
    ]
    params = {}
    for n, (fan_in, fan_out) in enumerate(dims, start=1):
        key, kw, kb = jax.random.split(key, 3)
        bound = 1.0 / jnp.sqrt(fan_in)
        params[f"w{n}"] = jax.random.uniform(
            kw, (fan_in, fan_out), jnp.float32, -bound, bound)
        params[f"b{n}"] = jax.random.uniform(
            kb, (1, fan_out), jnp.float32, -bound, bound)
    return params


def reference_forward(x_pdt, x_def, x_ref, params):
    x = jnp.concatenate([x_pdt, x_ref, x_def], axis=1)
    h = jnp.maximum(x @ params["w1"] + params["b1"], 0.0)
    h = jnp.maximum(h @ params["w2"] + params["b2"], 0.0)
    return h @ params["w3"] + params["b3"]


if __name__ == "__main__":
    # Small shapes consistent with the module's __init__/forward.
    input_dim = 16
    hidden_dim = 32
    output_dim = 8
    n_nodes = 64            # total nodes across the batch ("-1" dim in .view)

    key = jax.random.PRNGKey(0)
    key, k1, k2, k3, kp = jax.random.split(key, 5)
    x_pdt = jax.random.normal(k1, (n_nodes, input_dim), jnp.float32)
    x_def = jax.random.normal(k2, (n_nodes, input_dim), jnp.float32)
    x_ref = jax.random.normal(k3, (n_nodes, input_dim), jnp.float32)
    params = init_params(kp, input_dim, hidden_dim, output_dim)

    out = gnnstack_forward(x_pdt, x_def, x_ref, params)
    out = jax.block_until_ready(out)

    ref = reference_forward(x_pdt, x_def, x_ref, params)
    assert out.shape == (n_nodes, output_dim)
    # bf16 matmul operands + f32 accumulation -> loosened tolerance vs f32 ref.
    assert jnp.allclose(out, ref, atol=3e-2, rtol=3e-2), "mismatch vs reference"

    # TODO(synk): `data.batch` and the CrossEntropyLoss layer are not part of
    # this forward's compute (batch is unused, loss is a separate method), so
    # they are intentionally not implemented in the kernel.
    print("KERNEL_OK")
</pallas_src>

<mosaic_0001>
module attributes {stable_mosaic.version = 11 : i64} {
  func.func @gnnstack_mlp_kernel(%arg0: i32, %arg1: memref<64x16xbf16, #tpu.memory_space<vmem>>, %arg2: memref<64x16xbf16, #tpu.memory_space<vmem>>, %arg3: memref<64x16xbf16, #tpu.memory_space<vmem>>, %arg4: memref<16x32xbf16, #tpu.memory_space<vmem>>, %arg5: memref<16x32xbf16, #tpu.memory_space<vmem>>, %arg6: memref<16x32xbf16, #tpu.memory_space<vmem>>, %arg7: memref<1x32xf32, #tpu.memory_space<vmem>>, %arg8: memref<32x32xbf16, #tpu.memory_space<vmem>>, %arg9: memref<1x32xf32, #tpu.memory_space<vmem>>, %arg10: memref<32x128xbf16, #tpu.memory_space<vmem>>, %arg11: memref<1x128xf32, #tpu.memory_space<vmem>>, %arg12: memref<64x128xf32, #tpu.memory_space<vmem>>) attributes {dimension_semantics = [#tpu.dimension_semantics<parallel>], iteration_bounds = array<i64: 1>, scalar_prefetch = 0 : i64, scratch_operands = 0 : i64, tpu.core_type = #tpu.core_type<tc>, window_params = [{transform_indices = @transform_0, window_bounds = array<i64: 64, 16>}, {transform_indices = @transform_1, window_bounds = array<i64: 64, 16>}, {transform_indices = @transform_2, window_bounds = array<i64: 64, 16>}, {pipeline_mode = #tpu.pipeline_mode<synchronous>, transform_indices = @transform_3, window_bounds = array<i64: 16, 32>}, {pipeline_mode = #tpu.pipeline_mode<synchronous>, transform_indices = @transform_4, window_bounds = array<i64: 16, 32>}, {pipeline_mode = #tpu.pipeline_mode<synchronous>, transform_indices = @transform_5, window_bounds = array<i64: 16, 32>}, {pipeline_mode = #tpu.pipeline_mode<synchronous>, transform_indices = @transform_6, window_bounds = array<i64: 1, 32>}, {pipeline_mode = #tpu.pipeline_mode<synchronous>, transform_indices = @transform_7, window_bounds = array<i64: 32, 32>}, {pipeline_mode = #tpu.pipeline_mode<synchronous>, transform_indices = @transform_8, window_bounds = array<i64: 1, 32>}, {pipeline_mode = #tpu.pipeline_mode<synchronous>, transform_indices = @transform_9, window_bounds = array<i64: 32, 128>}, {pipeline_mode = #tpu.pipeline_mode<synchronous>, transform_indices = @transform_10, window_bounds = array<i64: 1, 128>}, {transform_indices = @transform_11, window_bounds = array<i64: 64, 128>}]} {
    %c0 = arith.constant 0 : index
    %c0_0 = arith.constant 0 : index
    %0 = vector.load %arg4[%c0, %c0_0] : memref<16x32xbf16, #tpu.memory_space<vmem>>, vector<16x32xbf16>
    %c0_1 = arith.constant 0 : index
    %c0_2 = arith.constant 0 : index
    %1 = vector.load %arg5[%c0_1, %c0_2] : memref<16x32xbf16, #tpu.memory_space<vmem>>, vector<16x32xbf16>
    %c0_3 = arith.constant 0 : index
    %c0_4 = arith.constant 0 : index
    %2 = vector.load %arg6[%c0_3, %c0_4] : memref<16x32xbf16, #tpu.memory_space<vmem>>, vector<16x32xbf16>
    %c0_5 = arith.constant 0 : index
    %c0_6 = arith.constant 0 : index
    %3 = vector.load %arg8[%c0_5, %c0_6] : memref<32x32xbf16, #tpu.memory_space<vmem>>, vector<32x32xbf16>
    %c0_7 = arith.constant 0 : index
    %c0_8 = arith.constant 0 : index
    %4 = vector.load %arg10[%c0_7, %c0_8] : memref<32x128xbf16, #tpu.memory_space<vmem>>, vector<32x128xbf16>
    %c0_9 = arith.constant 0 : index
    %c0_10 = arith.constant 0 : index
    %5 = vector.load %arg7[%c0_9, %c0_10] : memref<1x32xf32, #tpu.memory_space<vmem>>, vector<1x32xf32>
    %c0_11 = arith.constant 0 : index
    %c0_12 = arith.constant 0 : index
    %6 = vector.load %arg9[%c0_11, %c0_12] : memref<1x32xf32, #tpu.memory_space<vmem>>, vector<1x32xf32>
    %c0_13 = arith.constant 0 : index
    %c0_14 = arith.constant 0 : index
    %7 = vector.load %arg11[%c0_13, %c0_14] : memref<1x128xf32, #tpu.memory_space<vmem>>, vector<1x128xf32>
    %c0_i32 = arith.constant 0 : i32
    %c64_i32 = arith.constant 64 : i32
    %8 = arith.muli %c0_i32, %c64_i32 : i32
    %9 = tpu.assume_multiple %8, 8 : i32
    %10 = arith.index_cast %9 : i32 to index
    %c0_15 = arith.constant 0 : index
    %11 = vector.load %arg1[%10, %c0_15] : memref<64x16xbf16, #tpu.memory_space<vmem>>, vector<64x16xbf16>
    %cst = arith.constant dense<0.000000e+00> : vector<64x32xf32>
    %12 = tpu.matmul %11, %0, %cst {dimension_numbers = #tpu.dot_dimension_numbers<[1], [0], [0], [1], [0, 0, 1, 1], [], []>} : vector<64x16xbf16>, vector<16x32xbf16>, vector<64x32xf32> -> vector<64x32xf32>
    %13 = arith.index_cast %9 : i32 to index
    %c0_16 = arith.constant 0 : index
    %14 = vector.load %arg2[%13, %c0_16] : memref<64x16xbf16, #tpu.memory_space<vmem>>, vector<64x16xbf16>
    %cst_17 = arith.constant dense<0.000000e+00> : vector<64x32xf32>
    %15 = tpu.matmul %14, %1, %cst_17 {dimension_numbers = #tpu.dot_dimension_numbers<[1], [0], [0], [1], [0, 0, 1, 1], [], []>} : vector<64x16xbf16>, vector<16x32xbf16>, vector<64x32xf32> -> vector<64x32xf32>
    %16 = arith.addf %12, %15 : vector<64x32xf32>
    %17 = arith.index_cast %9 : i32 to index
    %c0_18 = arith.constant 0 : index
    %18 = vector.load %arg3[%17, %c0_18] : memref<64x16xbf16, #tpu.memory_space<vmem>>, vector<64x16xbf16>
    %cst_19 = arith.constant dense<0.000000e+00> : vector<64x32xf32>
    %19 = tpu.matmul %18, %2, %cst_19 {dimension_numbers = #tpu.dot_dimension_numbers<[1], [0], [0], [1], [0, 0, 1, 1], [], []>} : vector<64x16xbf16>, vector<16x32xbf16>, vector<64x32xf32> -> vector<64x32xf32>
    %20 = arith.addf %16, %19 : vector<64x32xf32>
    %21 = vector.broadcast %5 : vector<1x32xf32> to vector<64x32xf32>
    %22 = arith.addf %20, %21 : vector<64x32xf32>
    %cst_20 = arith.constant 0.000000e+00 : f32
    %23 = vector.broadcast %cst_20 : f32 to vector<64x32xf32>
    %24 = arith.maximumf %22, %23 : vector<64x32xf32>
    %25 = arith.truncf %24 : vector<64x32xf32> to vector<64x32xbf16>
    %cst_21 = arith.constant dense<0.000000e+00> : vector<64x32xf32>
    %26 = tpu.matmul %25, %3, %cst_21 {dimension_numbers = #tpu.dot_dimension_numbers<[1], [0], [0], [1], [0, 0, 1, 1], [], []>} : vector<64x32xbf16>, vector<32x32xbf16>, vector<64x32xf32> -> vector<64x32xf32>
    %27 = vector.broadcast %6 : vector<1x32xf32> to vector<64x32xf32>
    %28 = arith.addf %26, %27 : vector<64x32xf32>
    %cst_22 = arith.constant 0.000000e+00 : f32
    %29 = vector.broadcast %cst_22 : f32 to vector<64x32xf32>
    %30 = arith.maximumf %28, %29 : vector<64x32xf32>
    %31 = arith.truncf %30 : vector<64x32xf32> to vector<64x32xbf16>
    %cst_23 = arith.constant dense<0.000000e+00> : vector<64x128xf32>
    %32 = tpu.matmul %31, %4, %cst_23 {dimension_numbers = #tpu.dot_dimension_numbers<[1], [0], [0], [1], [0, 0, 1, 1], [], []>} : vector<64x32xbf16>, vector<32x128xbf16>, vector<64x128xf32> -> vector<64x128xf32>
    %33 = vector.broadcast %7 : vector<1x128xf32> to vector<64x128xf32>
    %34 = arith.addf %32, %33 : vector<64x128xf32>
    %35 = arith.index_cast %9 : i32 to index
    %c0_24 = arith.constant 0 : index
    %36 = vector.load %arg12[%35, %c0_24] : memref<64x128xf32, #tpu.memory_space<vmem>>, vector<64x128xf32>
    tpu.vector_store %arg12[%35, %c0_24], %34 {strides = array<i32>} : memref<64x128xf32, #tpu.memory_space<vmem>>, vector<64x128xf32>,
    %c1_i32 = arith.constant 1 : i32
    return
  }
  func.func @transform_0(%arg0: i32) -> (i32, i32) {
    %c0_i32 = arith.constant 0 : i32
    %c0_i32_0 = arith.constant 0 : i32
    return %arg0, %c0_i32 : i32, i32
  }
  func.func @transform_1(%arg0: i32) -> (i32, i32) {
    %c0_i32 = arith.constant 0 : i32
    %c0_i32_0 = arith.constant 0 : i32
    return %arg0, %c0_i32 : i32, i32
  }
  func.func @transform_2(%arg0: i32) -> (i32, i32) {
    %c0_i32 = arith.constant 0 : i32
    %c0_i32_0 = arith.constant 0 : i32
    return %arg0, %c0_i32 : i32, i32
  }
  func.func @transform_3(%arg0: i32) -> (i32, i32) {
    %c0_i32 = arith.constant 0 : i32
    %c0_i32_0 = arith.constant 0 : i32
    %c0_i32_1 = arith.constant 0 : i32
    return %c0_i32, %c0_i32_0 : i32, i32
  }
  func.func @transform_4(%arg0: i32) -> (i32, i32) {
    %c0_i32 = arith.constant 0 : i32
    %c0_i32_0 = arith.constant 0 : i32
    %c0_i32_1 = arith.constant 0 : i32
    return %c0_i32, %c0_i32_0 : i32, i32
  }
  func.func @transform_5(%arg0: i32) -> (i32, i32) {
    %c0_i32 = arith.constant 0 : i32
    %c0_i32_0 = arith.constant 0 : i32
    %c0_i32_1 = arith.constant 0 : i32
    return %c0_i32, %c0_i32_0 : i32, i32
  }
  func.func @transform_6(%arg0: i32) -> (i32, i32) {
    %c0_i32 = arith.constant 0 : i32
    %c0_i32_0 = arith.constant 0 : i32
    %c0_i32_1 = arith.constant 0 : i32
    return %c0_i32, %c0_i32_0 : i32, i32
  }
  func.func @transform_7(%arg0: i32) -> (i32, i32) {
    %c0_i32 = arith.constant 0 : i32
    %c0_i32_0 = arith.constant 0 : i32
    %c0_i32_1 = arith.constant 0 : i32
    return %c0_i32, %c0_i32_0 : i32, i32
  }
  func.func @transform_8(%arg0: i32) -> (i32, i32) {
    %c0_i32 = arith.constant 0 : i32
    %c0_i32_0 = arith.constant 0 : i32
    %c0_i32_1 = arith.constant 0 : i32
    return %c0_i32, %c0_i32_0 : i32, i32
  }
  func.func @transform_9(%arg0: i32) -> (i32, i32) {
    %c0_i32 = arith.constant 0 : i32
    %c0_i32_0 = arith.constant 0 : i32
    %c0_i32_1 = arith.constant 0 : i32
    return %c0_i32, %c0_i32_0 : i32, i32
  }
  func.func @transform_10(%arg0: i32) -> (i32, i32) {
    %c0_i32 = arith.constant 0 : i32
    %c0_i32_0 = arith.constant 0 : i32
    %c0_i32_1 = arith.constant 0 : i32
    return %c0_i32, %c0_i32_0 : i32, i32
  }
  func.func @transform_11(%arg0: i32) -> (i32, i32) {
    %c0_i32 = arith.constant 0 : i32
    %c0_i32_0 = arith.constant 0 : i32
    return %arg0, %c0_i32 : i32, i32
  }
}

</mosaic_0001>

<bundles_post_ra>
// kernel: tpu_custom_call.1
= control target key start
LH: loop header
LB: loop body
LE: loop exit
PB: predicated region body
PF: predicated region fallthrough
CT: control target
= control target key end

     0   :  { %vm99_vm0 = vcmask 130048   ;;  %s1000_s0 = inlined_call_operand.vmem [shape: bf16[64,16], index: 0, kind: input, shape index: {}]   ;;  %s1001_s1 = inlined_call_operand.vmem [shape: bf16[64,16], index: 1, kind: input, shape index: {}]   ;;  %s1002_s2 = inlined_call_operand.vmem [shape: bf16[64,16], index: 2, kind: input, shape index: {}]   ;;  %s1003_s3 = inlined_call_operand.vmem [shape: bf16[16,32], index: 3, kind: input, shape index: {}]   ;;  %s1004_s4 = inlined_call_operand.vmem [shape: bf16[16,32], index: 4, kind: input, shape index: {}]   ;;  %s1005_s5 = inlined_call_operand.vmem [shape: bf16[16,32], index: 5, kind: input, shape index: {}]   ;;  %s1006_s6 = inlined_call_operand.vmem [shape: f32[1,32], index: 6, kind: input, shape index: {}]   ;;  %s1007_s7 = inlined_call_operand.vmem [shape: bf16[32,32], index: 7, kind: input, shape index: {}]   ;;  %s1008_s8 = inlined_call_operand.vmem [shape: f32[1,32], index: 8, kind: input, shape index: {}]   ;;  %s1009_s9 = inlined_call_operand.vmem [shape: bf16[32,128], index: 9, kind: input, shape index: {}]   ;;  %s1010_s10 = inlined_call_operand.vmem [shape: f32[1,128], index: 10, kind: input, shape index: {}]   ;;  %s1011_s11 = inlined_call_operand.hbm [shape: f32[64,128], index: 11, kind: output, shape index: {}]  }
   0x1   :  { %v796_v0 = vld [vmem:[%s1004_s4] sm:$0xff]   ;;  %v798_v2 = vld [vmem:[%s1001_s1 + $0x8] sm:$0xff]   ;;  %v807_v6 = vld [vmem:[%s1001_s1 + $0x10] sm:$0xff]  }
   0x2   :  { %v797_v1 = vld [vmem:[%s1001_s1] sm:$0xff]   ;;  %721 = vmatprep.subr.bf16.mxu0 %v796_v0  ;;  %775 = vmatprep.subr.bf16.mxu1 %v796_v0  ;;  %v808_v7 = vld [vmem:[%s1001_s1 + $0x18] sm:$0xff]   ;;  %v801_v8 = vld [vmem:[%s1000_s0 + $0x8] sm:$0xff]  }
   0x3   :  { %722 = vmatpush3.bf16.msra.mxu0 %v796_v0  ;;  %723 = vmatprep.mubr.msk.bf16.mxu0 %vm99_vm0, %v797_v1  ;;  %v799_v3 = vld [vmem:[%s1003_s3] sm:$0xff]   ;;  %v803_v9 = vld [vmem:[%s1000_s0 + $0x10] sm:$0xff]  }
   0x4   :  { %v800_v4 = vld [vmem:[%s1000_s0] sm:$0xff]   ;;  %776 = vmatpush3.bf16.msra.mxu1 %v796_v0  ;;  %731 = vmatprep.subr.bf16.mxu0 %v799_v3 }
   0x5   :  { %v802_v5 = vld [vmem:[%s1005_s5] sm:$0xff]   ;;  %727 = vmatprep.mubr.msk.bf16.mxu1 %vm99_vm0, %v807_v6 }
   0x6   :  { %724 = vmatmul.mubr.msk.bf16.vlgmr.msra.gmra.mrb[0].mxu0 %vm99_vm0, %v798_v2 }
   0x7   :  { %732 = vmatpush3.bf16.msra.mxu0 %v799_v3  ;;  %733 = vmatprep.mubr.msk.bf16.mxu0 %vm99_vm0, %v800_v4 }
   0x8   :  { %741 = vmatprep.subr.bf16.mxu0 %v802_v5  ;;  %728 = vmatmul.mubr.msk.bf16.vlgmr.msra.gmra.mrb[0].mxu1 %vm99_vm0, %v808_v7 }
  0x12   :  { %734 = vmatmul.mubr.msk.bf16.vlgmr.msra.gmra.mrb[0].mxu0 %vm99_vm0, %v801_v8 }
  0x13   :  { %16 = vsyncpa [#allocation3], 0  ;;  %742 = vmatpush3.bf16.msra.mxu0 %v802_v5  ;;  %737 = vmatprep.mubr.msk.bf16.mxu0 %vm99_vm0, %v803_v9  ;;  %v804_v10 = vld [vmem:[%s1000_s0 + $0x18] sm:$0xff]   ;;  %v805_v11 = vld [vmem:[%s1002_s2] sm:$0xff]   ;;  %vm443_vm1 = vcmask 261120   ;;  %s839_s30 = smov [#allocation2]  }
  0x14   :  { %v806_v12 = vld [vmem:[%s1002_s2 + $0x8] sm:$0xff]   ;;  %v809_v13 = vld [vmem:[%s1002_s2 + $0x10] sm:$0xff]   ;;  %v810_v14 = vld [vmem:[%s1002_s2 + $0x18] sm:$0xff]   ;;  %s641_s12 = sshll.u32 %s839_s30, 4  ;;  %s642_s12 = int_to_ptr.vmem [resolvable:$true] %s641_s12 }
  0x15   :  { %v811_v15 = vld [vmem:[%s1007_s7] sm:$0xff]   ;;  %v812_v16 = vld [vmem:[%s1007_s7 + $0x8] sm:$0xff]   ;;  %p820_p1 = scmp.lt.s32.totalorder %s642_s12, %s642_s12 }
  0x16   :  { %751 = vmatprep.subr.bf16.mxu1 %v811_v15  ;;  %v813_v17 = vld [vmem:[%s1009_s9] sm:$0xff]   ;;  %v814_v55 = vld [vmem:[%s1009_s9 + $0x8] sm:$0xff]  }
  0x17   :  { %752 = vmatpush3.bf16.msra.mxu1 %v811_v15  ;;  %v679_v22 = vld [vmem:[%s1006_s6] ss:$0 sm:$0xff] }
  0x18   :  { %753 = vmatprep.subr.bf16.mxu1 %v812_v16  ;;  %v680_v56 = vld [vmem:[%s1008_s8] ss:$0 sm:$0xff] }
  0x1a   :  { %738 = vmatmul.mubr.msk.bf16.gmra.mrb[4].mxu0 %vm99_vm0, %v804_v10 }
  0x1b   :  { %743 = vmatprep.mubr.msk.bf16.mxu0 %vm99_vm0, %v805_v11  ;;  %754 = vmatpush3.bf16.msra.mxu1 %v812_v16 }
  0x1c   :  { %763 = vmatprep.subr.bf16.mxu1 %v813_v17 }
  0x22   :  { %744 = vmatmul.mubr.msk.bf16.vlgmr.msra.gmra.mrb[0].mxu0 %vm99_vm0, %v806_v12 }
  0x23   :  { %747 = vmatprep.mubr.msk.bf16.mxu0 %vm99_vm0, %v809_v13 }
  0x2a   :  { %748 = vmatmul.mubr.msk.bf16.gmra.mrb[4].mxu0 %vm99_vm0, %v810_v14 }
  0xdb   :  { %v729_v18 = vpop.f32.mrb[0].mxu1 }
  0xdc   :  { %v162_v19 = vpop.f32.mrb[1].mxu1 }
  0xdd   :  { %v730_v20 = vpop.f32.mrb[2].mxu1 }
  0xde   :  { %v165_v21 = vpop.f32.mrb[3].mxu1 }
  0xf5   :  { %v745_v23 = vpop.f32.mrb[0].mxu0 }
  0xf6   :  { %v407_v24 = vadd.f32 %v745_v23, %v679_v22  ;;  %v360_v25 = vpop.f32.mrb[1].mxu0 }
  0xf7   :  { %v405_v26 = vadd.f32 %v679_v22, %v360_v25  ;;  %v746_v27 = vpop.f32.mrb[2].mxu0 }
  0xf8   :  { %v408_v28 = vadd.f32 %v746_v27, %v679_v22  ;;  %v363_v29 = vpop.f32.mrb[3].mxu0  ;;  %v415_v31 = vmax.f32 %v407_v24, 0.0 }
  0xf9   :  { %v406_v30 = vadd.f32 %v679_v22, %v363_v29  ;;  %v413_v33 = vmax.f32 %v405_v26, 0.0 }
  0xfa   :  { %v416_v32 = vmax.f32 %v408_v28, 0.0 }
  0xfb   :  { %v414_v34 = vmax.f32 %v406_v30, 0.0 }
  0xfc   :  { %v422_v35 = vpack.c.bf16 %v416_v32, %v415_v31 }
  0xfd   :  { %v421_v36 = vpack.c.bf16 %v414_v34, %v413_v33  ;;  %v749_v37 = vpop.f32.mrb[4].mxu0 }
  0xfe   :  { %v777_v38 = vadd.f32 %v749_v37, %v729_v18  ;;  %v376_v39 = vpop.f32.mrb[5].mxu0 }
  0xff   :  { %v778_v40 = vadd.f32 %v376_v39, %v162_v19  ;;  %v750_v41 = vpop.f32.mrb[6].mxu0  ;;  %755 = vmatprep.mubr.msk.bf16.mxu1 %vm443_vm1, %v421_v36 }
 0x100   :  { %v411_v42 = vadd.f32 %v777_v38, %v679_v22  ;;  %v779_v43 = vadd.f32 %v750_v41, %v730_v20  ;;  %v379_v44 = vpop.f32.mrb[7].mxu0  ;;  %756 = vmatmul.mubr.msk.bf16.vlgmr.msra.gmra.mrb[4].mxu1 %vm443_vm1, %v422_v35 }
 0x101   :  { %v409_v45 = vadd.f32 %v778_v40, %v679_v22  ;;  %v780_v46 = vadd.f32 %v379_v44, %v165_v21  ;;  %764 = vmatpush3.bf16.msra.mxu1 %v813_v17  ;;  %v687_v21 = vld [vmem:[%s1010_s10] ss:$0 sm:$0xff]  ;;  %s815_s10 = scalar_lea.vmem %s642_s12, 1024 }
 0x102   :  { %v412_v47 = vadd.f32 %v779_v43, %v679_v22  ;;  %v419_v49 = vmax.f32 %v411_v42, 0.0  ;;  %765 = vmatprep.subr.bf16.mxu1 %v814_v55  ;;  %p816_p0 = scmp.ne.s32.totalorder %s642_s12, %s815_s10  ;;  %p821_p2 = scmp.lt.s32.totalorder %s815_s10, %s815_s10 }
 0x103   :  { %v410_v48 = vadd.f32 %v780_v46, %v679_v22  ;;  %v417_v51 = vmax.f32 %v409_v45, 0.0 }
 0x104   :  { %v420_v50 = vmax.f32 %v412_v47, 0.0  ;;  %p822_p3 = por %p821_p2, %p820_p1 }
 0x105   :  { %v418_v52 = vmax.f32 %v410_v48, 0.0  ;;  %766 = vmatpush3.bf16.msra.mxu1 %v814_v55 }
 0x106   :  { %v424_v53 = vpack.c.bf16 %v420_v50, %v419_v49  ;;  %p823_p4 = pnand %p822_p3, %p816_p0 }
 0x107   :  { %v423_v54 = vpack.c.bf16 %v418_v52, %v417_v51 }
 0x109   :  { %759 = vmatprep.mubr.msk.bf16.mxu1 %vm443_vm1, %v423_v54 }
 0x10a   :  { %760 = vmatmul.mubr.msk.bf16.gmra.mrb[8].mxu1 %vm443_vm1, %v424_v53 }
 0x1d3   :  { %v757_v57 = vpop.f32.mrb[4].mxu1 }
 0x1d4   :  { %v499_v58 = vadd.f32 %v757_v57, %v680_v56  ;;  %v490_v59 = vpop.f32.mrb[5].mxu1 }
 0x1d5   :  { %v491_v60 = vadd.f32 %v680_v56, %v490_v59  ;;  %v758_v61 = vpop.f32.mrb[6].mxu1 }
 0x1d6   :  { %v502_v62 = vadd.f32 %v758_v61, %v680_v56  ;;  %v493_v63 = vpop.f32.mrb[7].mxu1  ;;  %v523_v1 = vmax.f32 %v499_v58, 0.0 }
 0x1d7   :  { %v494_v0 = vadd.f32 %v680_v56, %v493_v63  ;;  %v521_v3 = vmax.f32 %v491_v60, 0.0 }
 0x1d8   :  { %v524_v2 = vmax.f32 %v502_v62, 0.0 }
 0x1d9   :  { %v522_v4 = vmax.f32 %v494_v0, 0.0 }
 0x1da   :  { %v530_v5 = vpack.c.bf16 %v524_v2, %v523_v1 }
 0x1db   :  { %v529_v6 = vpack.c.bf16 %v522_v4, %v521_v3 }
 0x1dd   :  { %v761_v7 = vpop.f32.mrb[8].mxu1  ;;  %767 = vmatprep.mubr.msk.bf16.mxu1 %vm443_vm1, %v529_v6 }
 0x1de   :  { %v515_v8 = vadd.f32 %v761_v7, %v680_v56  ;;  %v506_v9 = vpop.f32.mrb[9].mxu1  ;;  %768 = vmatmul.mubr.msk.bf16.vlgmr.msra.gmra.mrb[12].mxu1 %vm443_vm1, %v530_v5 }
 0x1df   :  { %v507_v10 = vadd.f32 %v680_v56, %v506_v9  ;;  %v762_v11 = vpop.f32.mrb[10].mxu1 }
 0x1e0   :  { %v518_v12 = vadd.f32 %v762_v11, %v680_v56  ;;  %v509_v13 = vpop.f32.mrb[11].mxu1  ;;  %v527_v15 = vmax.f32 %v515_v8, 0.0 }
 0x1e1   :  { %v510_v14 = vadd.f32 %v680_v56, %v509_v13  ;;  %v525_v17 = vmax.f32 %v507_v10, 0.0 }
 0x1e2   :  { %v528_v16 = vmax.f32 %v518_v12, 0.0 }
 0x1e3   :  { %v526_v18 = vmax.f32 %v510_v14, 0.0 }
 0x1e4   :  { %v532_v19 = vpack.c.bf16 %v528_v16, %v527_v15 }
 0x1e5   :  { %v531_v20 = vpack.c.bf16 %v526_v18, %v525_v17 }
 0x1e7   :  { %771 = vmatprep.mubr.msk.bf16.mxu1 %vm443_vm1, %v531_v20 }
 0x1e8   :  { %772 = vmatmul.mubr.msk.bf16.gmra.mrb[16].mxu1 %vm443_vm1, %v532_v19 }
 0x2b1   :  { %v769_v22 = vpop.f32.mrb[12].mxu1 }
 0x2b2   :  { %v606_v23 = vadd.f32 %v769_v22, %v687_v21  ;;  %v597_v24 = vpop.f32.mrb[13].mxu1 }
 0x2b3   :  { %v598_v25 = vadd.f32 %v687_v21, %v597_v24  ;;  %v770_v26 = vpop.f32.mrb[14].mxu1 }
 0x2b4   :  { %630 = vst [vmem:[#allocation2 + $0x10] sm:$0xff] %v606_v23  ;;  %v609_v27 = vadd.f32 %v770_v26, %v687_v21  ;;  %v600_v28 = vpop.f32.mrb[15].mxu1 }
 0x2b5   :  { %628 = vst [vmem:[#allocation2] sm:$0xff] %v598_v25  ;;  %v601_v29 = vadd.f32 %v687_v21, %v600_v28 }
 0x2b6   :  { %631 = vst [vmem:[#allocation2 + $0x18] sm:$0xff] %v609_v27 }
 0x2b7   :  { %629 = vst [vmem:[#allocation2 + $0x8] sm:$0xff] %v601_v29 }
 0x2bb   :  { %v773_v30 = vpop.f32.mrb[16].mxu1 }
 0x2bc   :  { %v622_v31 = vadd.f32 %v773_v30, %v687_v21  ;;  %v613_v32 = vpop.f32.mrb[17].mxu1 }
 0x2bd   :  { %v614_v33 = vadd.f32 %v687_v21, %v613_v32  ;;  %v774_v34 = vpop.f32.mrb[18].mxu1 }
 0x2be   :  { %634 = vst [vmem:[#allocation2 + $0x30] sm:$0xff] %v622_v31  ;;  %v625_v35 = vadd.f32 %v774_v34, %v687_v21  ;;  %v616_v36 = vpop.f32.mrb[19].mxu1 }
 0x2bf   :  { %632 = vst [vmem:[#allocation2 + $0x20] sm:$0xff] %v614_v33  ;;  %v617_v37 = vadd.f32 %v687_v21, %v616_v36 }
 0x2c0   :  { %635 = vst [vmem:[#allocation2 + $0x38] sm:$0xff] %v625_v35 }
 0x2c1   :  { %633 = vst [vmem:[#allocation2 + $0x28] sm:$0xff] %v617_v37 }
 0x2c2   :  { %826 = shalt.err (!%p823_p4)
}
 0x2c3   :  { %s827_s14 = scalar_lea.hbm %s1011_s11, 1024 }
 0x2c4   :  { %p828_p5 = scmp.ne.s32.totalorder %s1011_s11, %s827_s14  ;;  %p831_p6 = scmp.lt.u32.totalorder %s827_s14, %s1011_s11 }
 0x2c6   :  { %p833_p7 = pnand %p831_p6, %p828_p5 }
 0x2c8   :  { %836 = shalt.err (!%p833_p7)
}
 0x2c9   :  { %s840_s18 = smov 128   ;;  %s841_s19 = smov 8  }
 0x2ca   :  { %647 = dma.vmem_to_hbm [thread:$0]  %s642_s12, 1024, %s1011_s11, [#allocation3], %s840_s18, %s840_s18, %s841_s19  }
 0x2cb   :  { %837 = dma.done.wait [#allocation3], 1024  }
 0x2cc   :  { %838 = vsyncadd [#allocation3], 4294966272 }
 0x2cd   :  { %651 = vsyncpa [#allocation3], 1 }

</bundles_post_ra>
